<compile_context>
chip_gen: v7x
topology: tpu7x:2x2x1
jax: 0.10.0
libtpu: 0.0.40
codegen_flags: <defaults>
</compile_context>

<pallas_src>
import functools
import numpy as np

import jax
import jax.numpy as jnp
from jax import lax
from jax.experimental import pallas as pl
from jax.experimental.pallas import tpu as pltpu

_LANES = 128
# 2048x128 (f32 logits + bf16 one-hot) => ~1.5 MiB per tile pair, ~3 MiB double-buffered:
# comfortably inside every generation's scoped-VMEM budget, incl. v7x's 64 MiB physical.
_MAX_FOCAL_TILE_ROWS = 2048


def _ceil_to(x, m):
    return ((x + m - 1) // m) * m


# ----------------------------------------------------------------------------
# Fused Pallas kernel: sigmoid-focal CE + L1 ctrl-points + contrastive InfoNCE
# ----------------------------------------------------------------------------
def _fused_loss_kernel(
        logits_ref, tgt_ref,          # focal:       [tile_rows, 128] logits / bf16 one-hot
        l1a_ref, l1b_ref,             # L1:          [Rl, 128] f32
        emb_ref, neg_ref, mask_ref,   # contrastive: [MP, Dp], [NP, Dp], [MP, MP]
        out_ref,                      # per-core [8, 128] f32 output slab
        acc_ref,                      # VMEM (8, 128) f32 focal accumulator
        *,
        alpha, gamma, n_focal_valid, first_padded_block, blocks_per_core, n_cores,
        with_focal, with_l1, with_contrastive,
        temperature, m_valid, n_neg_valid):
    core = pl.program_id(0)
    blk = pl.program_id(1)
    last = blk == (blocks_per_core - 1)

    # ---- focal partial sums: every grid step, VPU-only accumulation ---------------
    if with_focal:
        @pl.when(blk == 0)
        def _init():
            acc_ref[...] = jnp.zeros_like(acc_ref)

        x = logits_ref[...].astype(jnp.float32)
        t = tgt_ref[...].astype(jnp.float32)
        rows, lanes = x.shape

        # 2 transcendentals/element:  s = sigmoid(|x|)
        #   BCE-with-logits = max(x,0) - x*t + log1p(exp(-|x|)) = max(x,0) - x*t - log(s)
        #   sigmoid(x)      = where(x >= 0, s, 1 - s)
        s = jax.nn.sigmoid(jnp.abs(x))
        ce = jnp.maximum(x, 0.0) - x * t - jnp.log(s)
        prob = jnp.where(x >= 0.0, s, 1.0 - s)
        p_t = prob * t + (1.0 - prob) * (1.0 - t)
        omp = 1.0 - p_t
        mod = omp * omp if float(gamma) == 2.0 else omp ** gamma
        loss = ce * mod
        if alpha >= 0:
            loss = (alpha * t + (1.0 - alpha) * (1.0 - t)) * loss

        gblk = core * blocks_per_core + blk

        @pl.when(gblk < first_padded_block)        # fully valid block: mask-free path
        def _acc_full():
            acc_ref[...] += jnp.sum(loss.reshape(rows // 8, 8, lanes), axis=0)

        @pl.when(gblk >= first_padded_block)       # any block containing padding
        def _acc_masked():
            row_i = lax.broadcasted_iota(jnp.int32, (rows, lanes), 0)
            lane_i = lax.broadcasted_iota(jnp.int32, (rows, lanes), 1)
            flat_i = (gblk * rows + row_i) * lanes + lane_i
            valid = (flat_i < n_focal_valid).astype(jnp.float32)
            acc_ref[...] += jnp.sum((loss * valid).reshape(rows // 8, 8, lanes), axis=0)

    # ---- finalize helpers ----------------------------------------------------------
    def _slab(focal_sum, l1_sum, anchor_sum, sim_sum):
        r = lax.broadcasted_iota(jnp.int32, (8, _LANES), 0)
        c = lax.broadcasted_iota(jnp.int32, (8, _LANES), 1)
        slab = jnp.where((r == 0) & (c == 0), focal_sum, 0.0)
        slab = jnp.where((r == 0) & (c == 1), l1_sum, slab)
        slab = jnp.where((r == 0) & (c == 2), anchor_sum, slab)
        slab = jnp.where((r == 0) & (c == 3), sim_sum, slab)
        return slab

    fin_main = jnp.logical_and(last, core == 0) if n_cores > 1 else last

    @pl.when(fin_main)
    def _finalize_main():
        focal_sum = jnp.sum(acc_ref[...]) if with_focal else jnp.float32(0.0)

        # F.l1_loss(reduction='sum'); zero padding contributes |0 - 0| = 0.
        if with_l1:
            l1_sum = jnp.sum(jnp.abs(l1a_ref[...].astype(jnp.float32) -
                                     l1b_ref[...].astype(jnp.float32)))
        else:
            l1_sum = jnp.float32(0.0)

        if with_contrastive:
            # F.normalize(p=2, dim=-1) with eps=1e-12: x / max(||x||, 1e-12)
            e = emb_ref[...].astype(jnp.float32)                          # [MP, Dp]
            en = e * lax.rsqrt(jnp.maximum(jnp.sum(e * e, -1, keepdims=True), 1e-24))
            g = neg_ref[...].astype(jnp.float32)                          # [NP, Dp]
            gn = g * lax.rsqrt(jnp.maximum(jnp.sum(g * g, -1, keepdims=True), 1e-24))
            dots = (((1,), (1,)), ((), ()))
            sim = lax.dot_general(en, en, dots,
                                  preferred_element_type=jnp.float32) / temperature
            nsim = lax.dot_general(en, gn, dots,
                                   preferred_element_type=jnp.float32) / temperature
            mp = sim.shape[0]
            npad = nsim.shape[1]
            neg_ok = (lax.broadcasted_iota(jnp.int32, (mp, npad), 1)
                      < n_neg_valid).astype(jnp.float32)
            neg_sum = jnp.sum(jnp.exp(nsim) * neg_ok, axis=-1, keepdims=True)  # [MP, 1]
            mask = mask_ref[...].astype(jnp.float32)                            # [MP, MP]
            pos = jnp.exp(sim)
            sim_sum = jnp.sum(mask * sim)

            # Reference semantics: the negative denominator depends only on the anchor i
            # and is cross-paired with EVERY masked positive (j,k).  Loop over anchors to
            # keep the working set at [MP,MP] instead of materializing an [MP,MP,MP] cube.
            row_id = lax.broadcasted_iota(jnp.int32, (mp, 1), 0)

            def body(i, acc):
                ns_i = jnp.sum(jnp.where(row_id == i, neg_sum, 0.0))       # scalar
                part = jnp.sum(mask * jnp.log(pos + ns_i + 1e-6))
                return acc + jnp.reshape(part, (1, 1))

            anchor_sum = lax.fori_loop(0, m_valid, body,
                                       jnp.zeros((1, 1), jnp.float32),
                                       unroll=m_valid <= 8)[0, 0]
        else:
            anchor_sum = jnp.float32(0.0)
            sim_sum = jnp.float32(0.0)

        out_ref[...] = _slab(focal_sum, l1_sum, anchor_sum, sim_sum)

    if n_cores > 1:
        @pl.when(jnp.logical_and(last, core > 0))
        def _finalize_partial():
            focal_sum = jnp.sum(acc_ref[...]) if with_focal else jnp.float32(0.0)
            out_ref[...] = _slab(focal_sum, jnp.float32(0.0),
                                 jnp.float32(0.0), jnp.float32(0.0))


# ----------------------------------------------------------------------------
# Layout helpers (device-side, traced inside the jit)
# ----------------------------------------------------------------------------
def _focal_layout(n_elems):
    """(total_rows, tile_rows, blocks_per_core, n_cores) for the lane-dense focal slab."""
    rows_min = max(-(-n_elems // _LANES), 1)
    rows_min = _ceil_to(rows_min, 16)            # 16: bf16 sublane packing of the one-hot
    tile_rows = min(_MAX_FOCAL_TILE_ROWS, rows_min)
    blocks = -(-rows_min // tile_rows)
    # Split the focal row range across two cores only when the at-most-one extra padded
    # block it may add is cheap relative to the total work (v7x dual TC; harmless on 1-TC).
    n_cores = 2 if (blocks >= 2 and (blocks % 2 == 0 or blocks >= 8)) else 1
    blocks = _ceil_to(blocks, n_cores)
    return blocks * tile_rows, tile_rows, blocks // n_cores, n_cores


def _to_slab(flat, rows):
    return jnp.pad(flat, (0, rows * _LANES - flat.shape[0])).reshape(rows, _LANES)


def _pad2d(x, rows, cols):
    return jnp.pad(x, ((0, rows - x.shape[0]), (0, cols - x.shape[1])))


# ----------------------------------------------------------------------------
# Fused, jitted forward: prep + single pallas_call + loss extraction
# ----------------------------------------------------------------------------
@functools.partial(
    jax.jit,
    static_argnames=("alpha", "gamma", "temperature", "contrastive_weight",
                     "with_focal", "with_l1", "with_contrastive", "want_card"))
def _fused_forward(pred_logits, pred_ctrl_points, query_embed,
                   target_classes, tgt_lengths, num_inst,
                   match_b, match_q, tgt_ctrl, neg_b, neg_j, pos_mask,
                   *, alpha, gamma, temperature, contrastive_weight,
                   with_focal, with_l1, with_contrastive, want_card):
    B, Q, P, C = pred_logits.shape

    # ---- focal prep: compact class map -> bf16 one-hot -> lane-dense slab ----------
    if with_focal:
        n_focal = B * Q * P * C
        rows, tile_rows, blocks_per_core, n_cores = _focal_layout(n_focal)
        onehot = (target_classes[..., None] ==
                  jnp.arange(C, dtype=target_classes.dtype)).astype(jnp.bfloat16)
        logits2d = _to_slab(pred_logits.reshape(-1), rows)
        tgt2d = _to_slab(onehot.reshape(-1), rows)
        first_padded_block = n_focal // (tile_rows * _LANES)
    else:
        n_focal, first_padded_block = 0, 0
        rows, tile_rows, blocks_per_core, n_cores = 16, 16, 1, 1
        logits2d = jnp.zeros((16, _LANES), jnp.float32)
        tgt2d = jnp.zeros((16, _LANES), jnp.bfloat16)

    # ---- L1 ctrl-point prep (device gather of matched queries) ---------------------
    if with_l1:
        src = pred_ctrl_points[match_b, match_q]               # [M, P, 2]
        l1_rows = _ceil_to(max(-(-src.size // _LANES), 1), 8)
        l1a2d = _to_slab(src.reshape(-1).astype(jnp.float32), l1_rows)
        l1b2d = _to_slab(tgt_ctrl.reshape(-1).astype(jnp.float32), l1_rows)
    else:
        l1a2d = l1b2d = jnp.zeros((8, _LANES), jnp.float32)

    # ---- contrastive prep (query_embed never leaves the device) --------------------
    if with_contrastive:
        M = int(match_b.shape[0])
        N = int(neg_b.shape[0])
        D = int(query_embed.shape[-1])
        MP, NP, Dp = _ceil_to(M, 8), _ceil_to(N, 8), _ceil_to(D, _LANES)
        sel = query_embed[match_b, match_q].mean(axis=1)       # [M, D]
        neg = query_embed[neg_b, neg_j].mean(axis=1)           # [N, D]
        emb2d = _pad2d(sel, MP, Dp)
        neg2d = _pad2d(neg, NP, Dp)
        mask2d = _pad2d(pos_mask.astype(jnp.float32), MP, MP)
        m_valid, n_neg = M, N
    else:
        emb2d = neg2d = jnp.zeros((8, _LANES), jnp.float32)
        mask2d = jnp.zeros((8, 8), jnp.float32)
        m_valid, n_neg = 1, 1

    # ---- VMEM budget from the actual buffers (not a blanket limit) -----------------
    def _bytes(a):
        return int(np.prod(a.shape)) * jnp.dtype(a.dtype).itemsize
    tile_bytes = tile_rows * _LANES * (jnp.dtype(logits2d.dtype).itemsize +
                                       jnp.dtype(tgt2d.dtype).itemsize)
    const_bytes = sum(_bytes(a) for a in (l1a2d, l1b2d, emb2d, neg2d, mask2d))
    budget = 2 * tile_bytes + 2 * const_bytes + 4 * 8 * _LANES * (2 + n_cores)
    vmem_limit = int(min(max(2 * budget + (8 << 20), 16 << 20), 48 << 20))

    kernel = functools.partial(
        _fused_loss_kernel,
        alpha=float(alpha), gamma=float(gamma),
        n_focal_valid=int(n_focal), first_padded_block=int(first_padded_block),
        blocks_per_core=int(blocks_per_core), n_cores=int(n_cores),
        with_focal=with_focal, with_l1=with_l1, with_contrastive=with_contrastive,
        temperature=float(temperature),
        m_valid=int(m_valid), n_neg_valid=int(n_neg))

    focal_idx = lambda c, i: (c * blocks_per_core + i, 0)
    const_spec = lambda a: pl.BlockSpec(a.shape, lambda c, i: (0, 0))

    slab = pl.pallas_call(
        kernel,
        out_shape=jax.ShapeDtypeStruct((n_cores * 8, _LANES), jnp.float32),
        grid_spec=pltpu.PrefetchScalarGridSpec(
            num_scalar_prefetch=0,
            grid=(n_cores, blocks_per_core),
            in_specs=[
                pl.BlockSpec((tile_rows, _LANES), focal_idx),   # logits (row-tiled)
                pl.BlockSpec((tile_rows, _LANES), focal_idx),   # bf16 one-hot targets
                const_spec(l1a2d), const_spec(l1b2d),
                const_spec(emb2d), const_spec(neg2d), const_spec(mask2d),
            ],
            out_specs=pl.BlockSpec((8, _LANES), lambda c, i: (c, 0)),
            scratch_shapes=[pltpu.VMEM((8, _LANES), jnp.float32)],
        ),
        compiler_params=pltpu.CompilerParams(
            dimension_semantics=("parallel", "arbitrary"),
            vmem_limit_bytes=vmem_limit,
        ),
    )(logits2d, tgt2d, l1a2d, l1b2d, emb2d, neg2d, mask2d)

    slab3 = slab.reshape(n_cores, 8, _LANES)
    num_inst = jnp.asarray(num_inst, jnp.float32)

    losses = {}
    if with_focal:
        # Reference (ndim-4 path): loss.mean((1,2)).sum()/num_inst * Q == sum(loss)/(P*num_inst)
        losses['loss_ce'] = jnp.sum(slab3[:, 0, 0]) / (float(P) * num_inst)
    if want_card:
        # @torch.no_grad() logging-only metric; degenerate argmax when C == 1, as in torch.
        card_pred = jnp.sum(
            jnp.argmax(jnp.mean(pred_logits, axis=-2), axis=-1) == 0, axis=1
        ).astype(jnp.float32)
        losses['cardinality_error'] = jnp.mean(jnp.abs(card_pred - tgt_lengths))
    if with_l1:
        losses['loss_ctrl_points'] = slab3[0, 0, 1] / num_inst
    if with_contrastive:
        p_count = jnp.sum(pos_mask.astype(jnp.float32))
        acc_c = slab3[0, 0, 2] - float(m_valid) * slab3[0, 0, 3]
        losses['contrastive_loss'] = (float(contrastive_weight) * acc_c
                                      / (p_count * float(m_valid)))
    else:
        losses['contrastive_loss'] = jnp.float32(0.0)
    return losses


# ----------------------------------------------------------------------------
# Host-side glue (matching indices, GIoU negative mining, bookkeeping)
# ----------------------------------------------------------------------------
def _get_src_permutation_idx(indices):
    srcs = [np.asarray(src) for src, _ in indices]
    if sum(int(s.size) for s in srcs) == 0:
        return np.zeros((0,), np.int64), np.zeros((0,), np.int64)
    batch_idx = np.concatenate([np.full(s.shape, i, np.int64) for i, s in enumerate(srcs)])
    src_idx = np.concatenate([s.astype(np.int64) for s in srcs])
    return batch_idx, src_idx


def _generalized_box_iou_np(boxes1, boxes2):
    area1 = (boxes1[:, 2] - boxes1[:, 0]) * (boxes1[:, 3] - boxes1[:, 1])
    area2 = (boxes2[:, 2] - boxes2[:, 0]) * (boxes2[:, 3] - boxes2[:, 1])
    lt = np.maximum(boxes1[:, None, :2], boxes2[None, :, :2])
    rb = np.minimum(boxes1[:, None, 2:], boxes2[None, :, 2:])
    wh = np.clip(rb - lt, 0.0, None)
    inter = wh[..., 0] * wh[..., 1]
    union = area1[:, None] + area2[None, :] - inter
    iou = inter / union
    lt_e = np.minimum(boxes1[:, None, :2], boxes2[None, :, :2])
    rb_e = np.maximum(boxes1[:, None, 2:], boxes2[None, :, 2:])
    wh_e = np.clip(rb_e - lt_e, 0.0, None)
    area_e = wh_e[..., 0] * wh_e[..., 1]
    return iou - (area_e - union) / area_e


# ----------------------------------------------------------------------------
# SetCriterion (forward semantics)
# ----------------------------------------------------------------------------
class SetCriterionPallas:
    def __init__(self, num_classes, num_ctrl_points, dec_losses,
                 focal_alpha=0.25, focal_gamma=2.0,
                 temperature=0.5, iou_threshold=0.4, contrastive_weight=2.0):
        self.num_classes = num_classes
        self.num_ctrl_points = num_ctrl_points
        self.dec_losses = dec_losses
        self.focal_alpha = focal_alpha
        self.focal_gamma = focal_gamma
        self.temperature = temperature
        self.iou_threshold = iou_threshold
        self.contrastive_weight = contrastive_weight

    def forward(self, outputs, targets, indices, fp_data=None):
        # TODO(synk): Hungarian dec_matcher/enc_matcher has no clean Pallas equivalent;
        #             deterministic precomputed matching indices are passed in.
        # TODO(synk): distributed all_reduce / get_world_size omitted (single host).
        # TODO(synk): 'aux_outputs' / 'enc_outputs' branches not exercised (absent here).
        pred_logits = outputs['pred_logits']
        pred_ctrl_points = outputs['pred_ctrl_points']
        query_embed = outputs['query_embed']
        B, Q, P, C = pred_logits.shape

        for loss in self.dec_losses:
            if loss not in ('labels', 'cardinality', 'ctrl_points'):
                # TODO(synk): 'boxes' (L1 + GIoU on pred_boxes) not implemented here.
                raise AssertionError(f'do you really want to compute {loss} loss?')
        want_focal = 'labels' in self.dec_losses
        want_card = 'cardinality' in self.dec_losses
        want_l1 = 'ctrl_points' in self.dec_losses

        num_inst = sum(int(np.asarray(t['ctrl_points']).shape[0]) for t in targets)
        num_inst = max(float(num_inst), 1.0)

        # ---- host glue: matching bookkeeping (data-dependent) ----------------------
        batch_idx, src_idx = _get_src_permutation_idx(indices)
        M = int(src_idx.shape[0])

        target_classes = np.full((B, Q, P), self.num_classes, dtype=np.int32)
        for b, (src, tgt) in enumerate(indices):
            src = np.asarray(src)
            tgt = np.asarray(tgt)
            if src.size:
                lbls = np.asarray(targets[b]['labels'])[tgt]
                target_classes[b, src, :] = lbls[:, None]

        if M > 0:
            tgt_ctrl = np.concatenate(
                [np.asarray(t['ctrl_points'])[np.asarray(i_)]
                 for t, (_, i_) in zip(targets, indices) if np.asarray(i_).size],
                axis=0).astype(np.float32)
            match_b = batch_idx.astype(np.int32)
            match_q = src_idx.astype(np.int32)
            labels_cat = np.concatenate(
                [np.asarray(t['labels'])[np.asarray(J)]
                 for t, (_, J) in zip(targets, indices) if np.asarray(J).size])
            eq = labels_cat[None, :] == labels_cat[:, None]
            positives_mask = (eq & ~np.eye(M, dtype=bool)).astype(np.float32)
            p_count = int(positives_mask.sum())
        else:
            tgt_ctrl = np.zeros((1, P, 2), np.float32)
            match_b = match_q = np.zeros((1,), np.int32)
            positives_mask = np.zeros((1, 1), np.float32)
            p_count = 0
        l1_on = want_l1 and M > 0

        # Negative mining: GIoU(unmatched-query bbox, fp bbox) > threshold.  The ctrl
        # points come to host once (data-dependent control flow); query_embed stays on
        # device and is gathered inside the jitted call.
        pred_boxes_np = np.asarray(pred_ctrl_points)
        matched_per_img = [set() for _ in range(B)]
        for bb, qq in zip(batch_idx.tolist(), src_idx.tolist()):
            matched_per_img[int(bb)].add(int(qq))
        neg_b, neg_j = [], []
        for b, fp_info in enumerate(fp_data or []):
            fp = fp_info.get('fp_bboxes', [])
            uj = np.array(sorted(set(range(Q)) - matched_per_img[b]), dtype=np.int64)
            if len(fp) == 0 or uj.size == 0:
                continue
            pts = pred_boxes_np[b, uj]                                   # [U, P, 2]
            bboxes = np.stack([pts[..., 0].min(1), pts[..., 1].min(1),
                               pts[..., 0].max(1), pts[..., 1].max(1)], axis=1)
            fp_arr = np.asarray(fp, dtype=np.float32).reshape(-1, 4)
            giou = _generalized_box_iou_np(bboxes.astype(np.float32), fp_arr)  # [U, F]
            u_sel, _ = np.nonzero(giou > self.iou_threshold)
            neg_b.extend([b] * len(u_sel))
            neg_j.extend(uj[u_sel].tolist())
        N = len(neg_b)
        contrastive_on = (N > 0) and (p_count > 0)
        if contrastive_on:
            nb = np.asarray(neg_b, np.int32)
            nj = np.asarray(neg_j, np.int32)
        else:
            nb = nj = np.zeros((1,), np.int32)

        tgt_lengths = np.asarray(
            [int(np.asarray(t['labels']).shape[0]) for t in targets], np.float32)

        # ---- single jitted device program: prep + fused Pallas kernel + scaling ----
        losses = dict(_fused_forward(
            pred_logits, pred_ctrl_points, query_embed,
            jnp.asarray(target_classes), jnp.asarray(tgt_lengths),
            np.float32(num_inst),
            jnp.asarray(match_b), jnp.asarray(match_q), jnp.asarray(tgt_ctrl),
            jnp.asarray(nb), jnp.asarray(nj), jnp.asarray(positives_mask),
            alpha=float(self.focal_alpha), gamma=float(self.focal_gamma),
            temperature=float(self.temperature),
            contrastive_weight=float(self.contrastive_weight),
            with_focal=bool(want_focal), with_l1=bool(l1_on),
            with_contrastive=bool(contrastive_on), want_card=bool(want_card)))

        if want_l1 and not l1_on:
            losses['loss_ctrl_points'] = jnp.float32(0.0)
        return losses


# ----------------------------------------------------------------------------
if __name__ == "__main__":
    B, Q, P, C, D = 2, 8, 4, 1, 32   # batch, queries, ctrl points, classes, hidden

    key = jax.random.PRNGKey(0)
    k1, k2, k3, k4, k5 = jax.random.split(key, 5)
    pred_logits = jax.random.normal(k1, (B, Q, P, C), dtype=jnp.float32)
    pred_ctrl_points = jax.random.uniform(k2, (B, Q, P, 2), dtype=jnp.float32)
    query_embed = jax.random.normal(k3, (B, Q, P, D), dtype=jnp.float32)
    outputs = {'pred_logits': pred_logits,
               'pred_ctrl_points': pred_ctrl_points,
               'query_embed': query_embed}

    # targets: image 0 has 3 instances, image 1 has 2 (single class: text)
    nT = [3, 2]
    tkeys = [k4, k5]
    targets = []
    for i, n in enumerate(nT):
        targets.append({'labels': jnp.zeros((n,), dtype=jnp.int32),
                        'ctrl_points': jax.random.uniform(tkeys[i], (n, P, 2),
                                                          dtype=jnp.float32)})

    # deterministic matching: query q <-> target q
    indices = [(np.arange(n, dtype=np.int64), np.arange(n, dtype=np.int64)) for n in nT]

    # fp_data: one FP bbox per image coinciding with an unmatched query's ctrl-point
    # bbox, so at least one negative embedding is selected deterministically.
    pb = np.asarray(pred_ctrl_points)
    fp_data = []
    for i, n in enumerate(nT):
        pts = pb[i, n]   # first unmatched query of image i
        fp_data.append({'fp_bboxes': [[float(pts[:, 0].min()), float(pts[:, 1].min()),
                                       float(pts[:, 0].max()), float(pts[:, 1].max())]]})

    criterion = SetCriterionPallas(
        num_classes=C, num_ctrl_points=P,
        dec_losses=['labels', 'cardinality', 'ctrl_points'],
        focal_alpha=0.25, focal_gamma=2.0,
        temperature=0.5, iou_threshold=0.4, contrastive_weight=2.0)

    losses = criterion.forward(outputs, targets, indices, fp_data=fp_data)
    jax.block_until_ready(losses)
    print("KERNEL_OK")
</pallas_src>

<mosaic_0001>
module attributes {stable_mosaic.version = 11 : i64} {
  func.func @_fused_loss_kernel(%arg0: i32, %arg1: i32, %arg2: memref<16x128xf32, #tpu.memory_space<vmem>>, %arg3: memref<16x128xbf16, #tpu.memory_space<vmem>>, %arg4: memref<8x128xf32, #tpu.memory_space<vmem>>, %arg5: memref<8x128xf32, #tpu.memory_space<vmem>>, %arg6: memref<8x128xf32, #tpu.memory_space<vmem>>, %arg7: memref<8x128xf32, #tpu.memory_space<vmem>>, %arg8: memref<8x8xf32, #tpu.memory_space<vmem>>, %arg9: memref<8x128xf32, #tpu.memory_space<vmem>>, %arg10: memref<8x128xf32, #tpu.memory_space<vmem>>) attributes {dimension_semantics = [#tpu.dimension_semantics<parallel>, #tpu.dimension_semantics<arbitrary>], iteration_bounds = array<i64: 1, 1>, scalar_prefetch = 0 : i64, scratch_operands = 1 : i64, tpu.core_type = #tpu.core_type<tc>, window_params = [{transform_indices = @transform_0, window_bounds = array<i64: 16, 128>}, {transform_indices = @transform_1, window_bounds = array<i64: 16, 128>}, {pipeline_mode = #tpu.pipeline_mode<synchronous>, transform_indices = @transform_2, window_bounds = array<i64: 8, 128>}, {pipeline_mode = #tpu.pipeline_mode<synchronous>, transform_indices = @transform_3, window_bounds = array<i64: 8, 128>}, {pipeline_mode = #tpu.pipeline_mode<synchronous>, transform_indices = @transform_4, window_bounds = array<i64: 8, 128>}, {pipeline_mode = #tpu.pipeline_mode<synchronous>, transform_indices = @transform_5, window_bounds = array<i64: 8, 128>}, {pipeline_mode = #tpu.pipeline_mode<synchronous>, transform_indices = @transform_6, window_bounds = array<i64: 8, 8>}, {transform_indices = @transform_7, window_bounds = array<i64: 8, 128>}]} {
    %c0_i32 = arith.constant 0 : i32
    %0 = arith.cmpi eq, %arg1, %c0_i32 : i32
    %c0_i32_0 = arith.constant 0 : i32
    %1 = arith.cmpi eq, %arg1, %c0_i32_0 : i32
    %2 = arith.extui %1 : i1 to i32
    %c0_i32_1 = arith.constant 0 : i32
    %3 = arith.cmpi ne, %2, %c0_i32_1 : i32
    scf.if %3 {
      %cst_19 = arith.constant 0.000000e+00 : f32
      %53 = vector.broadcast %cst_19 : f32 to vector<8x128xf32>
      %c0_20 = arith.constant 0 : index
      %c0_21 = arith.constant 0 : index
      %54 = vector.load %arg10[%c0_20, %c0_21] : memref<8x128xf32, #tpu.memory_space<vmem>>, vector<8x128xf32>
      tpu.vector_store %arg10[%c0_20, %c0_21], %53 {strides = array<i32>} : memref<8x128xf32, #tpu.memory_space<vmem>>, vector<8x128xf32>,
    } else {
    }
    %c0 = arith.constant 0 : index
    %c0_2 = arith.constant 0 : index
    %4 = vector.load %arg2[%c0, %c0_2] : memref<16x128xf32, #tpu.memory_space<vmem>>, vector<16x128xf32>
    %c0_3 = arith.constant 0 : index
    %c0_4 = arith.constant 0 : index
    %5 = vector.load %arg3[%c0_3, %c0_4] : memref<16x128xbf16, #tpu.memory_space<vmem>>, vector<16x128xbf16>
    %6 = arith.extf %5 : vector<16x128xbf16> to vector<16x128xf32>
    %7 = math.absf %4 : vector<16x128xf32>
    %8 = arith.negf %7 : vector<16x128xf32>
    %9 = math.exp %8 : vector<16x128xf32>
    %cst = arith.constant 1.000000e+00 : f32
    %10 = vector.broadcast %cst : f32 to vector<16x128xf32>
    %11 = arith.addf %10, %9 : vector<16x128xf32>
    %12 = arith.divf %10, %11 : vector<16x128xf32>
    %cst_5 = arith.constant 0.000000e+00 : f32
    %13 = vector.broadcast %cst_5 : f32 to vector<16x128xf32>
    %14 = arith.maximumf %4, %13 : vector<16x128xf32>
    %15 = arith.mulf %4, %6 : vector<16x128xf32>
    %16 = arith.subf %14, %15 : vector<16x128xf32>
    %17 = math.log %12 : vector<16x128xf32>
    %18 = arith.subf %16, %17 : vector<16x128xf32>
    %cst_6 = arith.constant 0.000000e+00 : f32
    %19 = vector.broadcast %cst_6 : f32 to vector<16x128xf32>
    %20 = arith.cmpf oge, %4, %19 : vector<16x128xf32>
    %cst_7 = arith.constant 1.000000e+00 : f32
    %21 = vector.broadcast %cst_7 : f32 to vector<16x128xf32>
    %22 = arith.subf %21, %12 : vector<16x128xf32>
    %23 = arith.select %20, %12, %22 : vector<16x128xi1>, vector<16x128xf32>
    %24 = arith.mulf %23, %6 : vector<16x128xf32>
    %cst_8 = arith.constant 1.000000e+00 : f32
    %25 = vector.broadcast %cst_8 : f32 to vector<16x128xf32>
    %26 = arith.subf %25, %23 : vector<16x128xf32>
    %cst_9 = arith.constant 1.000000e+00 : f32
    %27 = vector.broadcast %cst_9 : f32 to vector<16x128xf32>
    %28 = arith.subf %27, %6 : vector<16x128xf32>
    %29 = arith.mulf %26, %28 : vector<16x128xf32>
    %30 = arith.addf %24, %29 : vector<16x128xf32>
    %cst_10 = arith.constant 1.000000e+00 : f32
    %31 = vector.broadcast %cst_10 : f32 to vector<16x128xf32>
    %32 = arith.subf %31, %30 : vector<16x128xf32>
    %33 = arith.mulf %32, %32 : vector<16x128xf32>
    %34 = arith.mulf %18, %33 : vector<16x128xf32>
    %cst_11 = arith.constant 2.500000e-01 : f32
    %35 = vector.broadcast %cst_11 : f32 to vector<16x128xf32>
    %36 = arith.mulf %35, %6 : vector<16x128xf32>
    %cst_12 = arith.constant 1.000000e+00 : f32
    %37 = vector.broadcast %cst_12 : f32 to vector<16x128xf32>
    %38 = arith.subf %37, %6 : vector<16x128xf32>
    %cst_13 = arith.constant 7.500000e-01 : f32
    %39 = vector.broadcast %cst_13 : f32 to vector<16x128xf32>
    %40 = arith.mulf %39, %38 : vector<16x128xf32>
    %41 = arith.addf %36, %40 : vector<16x128xf32>
    %42 = arith.mulf %41, %34 : vector<16x128xf32>
    %c1_i32 = arith.constant 1 : i32
    %43 = arith.muli %arg0, %c1_i32 : i32
    %44 = arith.addi %43, %arg1 : i32
    %c0_i32_14 = arith.constant 0 : i32
    %45 = arith.cmpi slt, %44, %c0_i32_14 : i32
    %46 = arith.extui %45 : i1 to i32
    %c0_i32_15 = arith.constant 0 : i32
    %47 = arith.cmpi ne, %46, %c0_i32_15 : i32
    scf.if %47 {
      %c0_19 = arith.constant 0 : index
      %c0_20 = arith.constant 0 : index
      %53 = vector.load %arg10[%c0_19, %c0_20] : memref<8x128xf32, #tpu.memory_space<vmem>>, vector<8x128xf32>
      %54 = vector.shape_cast %42 : vector<16x128xf32> to vector<2x8x128xf32>
      %cst_21 = arith.constant dense<0.000000e+00> : vector<8x128xf32>
      %55 = vector.multi_reduction <add>, %54, %cst_21 [0] : vector<2x8x128xf32> to vector<8x128xf32>
      %56 = arith.addf %53, %55 : vector<8x128xf32>
      %c0_22 = arith.constant 0 : index
      %c0_23 = arith.constant 0 : index
      %57 = vector.load %arg10[%c0_22, %c0_23] : memref<8x128xf32, #tpu.memory_space<vmem>>, vector<8x128xf32>
      tpu.vector_store %arg10[%c0_22, %c0_23], %56 {strides = array<i32>} : memref<8x128xf32, #tpu.memory_space<vmem>>, vector<8x128xf32>,
    } else {
    }
    %c0_i32_16 = arith.constant 0 : i32
    %48 = arith.cmpi sge, %44, %c0_i32_16 : i32
    %49 = arith.extui %48 : i1 to i32
    %c0_i32_17 = arith.constant 0 : i32
    %50 = arith.cmpi ne, %49, %c0_i32_17 : i32
    scf.if %50 {
      %53 = tpu.iota {dimensions = array<i32: 0>} : vector<16x128xi32>
      %54 = tpu.iota {dimensions = array<i32: 1>} : vector<16x128xi32>
      %c16_i32 = arith.constant 16 : i32
      %55 = arith.muli %44, %c16_i32 : i32
      %56 = vector.broadcast %55 : i32 to vector<16x128xi32>
      %57 = arith.addi %56, %53 : vector<16x128xi32>
      %c128_i32 = arith.constant 128 : i32
      %58 = vector.broadcast %c128_i32 : i32 to vector<16x128xi32>
      %59 = arith.muli %57, %58 : vector<16x128xi32>
      %60 = arith.addi %59, %54 : vector<16x128xi32>
      %c64_i32 = arith.constant 64 : i32
      %61 = vector.broadcast %c64_i32 : i32 to vector<16x128xi32>
      %62 = arith.cmpi slt, %60, %61 : vector<16x128xi32>
      %63 = arith.extui %62 : vector<16x128xi1> to vector<16x128xi32>
      %64 = arith.sitofp %63 : vector<16x128xi32> to vector<16x128xf32>
      %c0_19 = arith.constant 0 : index
      %c0_20 = arith.constant 0 : index
      %65 = vector.load %arg10[%c0_19, %c0_20] : memref<8x128xf32, #tpu.memory_space<vmem>>, vector<8x128xf32>
      %66 = arith.mulf %42, %64 : vector<16x128xf32>
      %67 = vector.shape_cast %66 : vector<16x128xf32> to vector<2x8x128xf32>
      %cst_21 = arith.constant dense<0.000000e+00> : vector<8x128xf32>
      %68 = vector.multi_reduction <add>, %67, %cst_21 [0] : vector<2x8x128xf32> to vector<8x128xf32>
      %69 = arith.addf %65, %68 : vector<8x128xf32>
      %c0_22 = arith.constant 0 : index
      %c0_23 = arith.constant 0 : index
      %70 = vector.load %arg10[%c0_22, %c0_23] : memref<8x128xf32, #tpu.memory_space<vmem>>, vector<8x128xf32>
      tpu.vector_store %arg10[%c0_22, %c0_23], %69 {strides = array<i32>} : memref<8x128xf32, #tpu.memory_space<vmem>>, vector<8x128xf32>,
    } else {
    }
    %51 = arith.extui %0 : i1 to i32
    %c0_i32_18 = arith.constant 0 : i32
    %52 = arith.cmpi ne, %51, %c0_i32_18 : i32
    scf.if %52 {
      %c0_19 = arith.constant 0 : index
      %c0_20 = arith.constant 0 : index
      %53 = vector.load %arg10[%c0_19, %c0_20] : memref<8x128xf32, #tpu.memory_space<vmem>>, vector<8x128xf32>
      %54 = vector.shape_cast %53 : vector<8x128xf32> to vector<1x8x128xf32>
      %cst_21 = arith.constant dense<0.000000e+00> : vector<1xf32>
      %55 = vector.multi_reduction <add>, %54, %cst_21 [1, 2] : vector<1x8x128xf32> to vector<1xf32>
      %56 = vector.shape_cast %55 : vector<1xf32> to vector<1x1x1xf32>
      %57 = vector.extract %56[0, 0, 0] : f32 from vector<1x1x1xf32>
      %c0_22 = arith.constant 0 : index
      %c0_23 = arith.constant 0 : index
      %58 = vector.load %arg4[%c0_22, %c0_23] : memref<8x128xf32, #tpu.memory_space<vmem>>, vector<8x128xf32>
      %c0_24 = arith.constant 0 : index
      %c0_25 = arith.constant 0 : index
      %59 = vector.load %arg5[%c0_24, %c0_25] : memref<8x128xf32, #tpu.memory_space<vmem>>, vector<8x128xf32>
      %60 = arith.subf %58, %59 : vector<8x128xf32>
      %61 = math.absf %60 : vector<8x128xf32>
      %62 = vector.shape_cast %61 : vector<8x128xf32> to vector<1x8x128xf32>
      %cst_26 = arith.constant dense<0.000000e+00> : vector<1xf32>
      %63 = vector.multi_reduction <add>, %62, %cst_26 [1, 2] : vector<1x8x128xf32> to vector<1xf32>
      %64 = vector.shape_cast %63 : vector<1xf32> to vector<1x1x1xf32>
      %65 = vector.extract %64[0, 0, 0] : f32 from vector<1x1x1xf32>
      %c0_27 = arith.constant 0 : index
      %c0_28 = arith.constant 0 : index
      %66 = vector.load %arg6[%c0_27, %c0_28] : memref<8x128xf32, #tpu.memory_space<vmem>>, vector<8x128xf32>
      %67 = arith.mulf %66, %66 : vector<8x128xf32>
      %cst_29 = arith.constant dense<0.000000e+00> : vector<8xf32>
      %68 = vector.multi_reduction <add>, %67, %cst_29 [1] : vector<8x128xf32> to vector<8xf32>
      %69 = vector.shape_cast %68 : vector<8xf32> to vector<8x1xf32>
      %cst_30 = arith.constant 1.000000e-24 : f32
      %70 = vector.broadcast %cst_30 : f32 to vector<8x1xf32>
      %71 = arith.maximumf %69, %70 : vector<8x1xf32>
      %72 = math.rsqrt %71 : vector<8x1xf32>
      %73 = vector.broadcast %72 : vector<8x1xf32> to vector<8x128xf32>
      %74 = arith.mulf %66, %73 : vector<8x128xf32>
      %c0_31 = arith.constant 0 : index
      %c0_32 = arith.constant 0 : index
      %75 = vector.load %arg7[%c0_31, %c0_32] : memref<8x128xf32, #tpu.memory_space<vmem>>, vector<8x128xf32>
      %76 = arith.mulf %75, %75 : vector<8x128xf32>
      %cst_33 = arith.constant dense<0.000000e+00> : vector<8xf32>
      %77 = vector.multi_reduction <add>, %76, %cst_33 [1] : vector<8x128xf32> to vector<8xf32>
      %78 = vector.shape_cast %77 : vector<8xf32> to vector<8x1xf32>
      %cst_34 = arith.constant 1.000000e-24 : f32
      %79 = vector.broadcast %cst_34 : f32 to vector<8x1xf32>
      %80 = arith.maximumf %78, %79 : vector<8x1xf32>
      %81 = math.rsqrt %80 : vector<8x1xf32>
      %82 = vector.broadcast %81 : vector<8x1xf32> to vector<8x128xf32>
      %83 = arith.mulf %75, %82 : vector<8x128xf32>
      %cst_35 = arith.constant dense<0.000000e+00> : vector<8x8xf32>
      %84 = tpu.matmul %74, %74, %cst_35 {dimension_numbers = #tpu.dot_dimension_numbers<[1], [1], [0], [0], [0, 0, 1, 0], [], []>} : vector<8x128xf32>, vector<8x128xf32>, vector<8x8xf32> -> vector<8x8xf32>
      %cst_36 = arith.constant 5.000000e-01 : f32
      %85 = vector.broadcast %cst_36 : f32 to vector<8x8xf32>
      %86 = arith.divf %84, %85 : vector<8x8xf32>
      %cst_37 = arith.constant dense<0.000000e+00> : vector<8x8xf32>
      %87 = tpu.matmul %74, %83, %cst_37 {dimension_numbers = #tpu.dot_dimension_numbers<[1], [1], [0], [0], [0, 0, 1, 0], [], []>} : vector<8x128xf32>, vector<8x128xf32>, vector<8x8xf32> -> vector<8x8xf32>
      %cst_38 = arith.constant 5.000000e-01 : f32
      %88 = vector.broadcast %cst_38 : f32 to vector<8x8xf32>
      %89 = arith.divf %87, %88 : vector<8x8xf32>
      %90 = tpu.iota {dimensions = array<i32: 1>} : vector<8x8xi32>
      %c3_i32 = arith.constant 3 : i32
      %91 = vector.broadcast %c3_i32 : i32 to vector<8x8xi32>
      %92 = arith.cmpi slt, %90, %91 : vector<8x8xi32>
      %93 = arith.extui %92 : vector<8x8xi1> to vector<8x8xi32>
      %94 = arith.sitofp %93 : vector<8x8xi32> to vector<8x8xf32>
      %95 = math.exp %89 : vector<8x8xf32>
      %96 = arith.mulf %95, %94 : vector<8x8xf32>
      %cst_39 = arith.constant dense<0.000000e+00> : vector<8xf32>
      %97 = vector.multi_reduction <add>, %96, %cst_39 [1] : vector<8x8xf32> to vector<8xf32>
      %98 = vector.shape_cast %97 : vector<8xf32> to vector<8x1xf32>
      %c0_40 = arith.constant 0 : index
      %c0_41 = arith.constant 0 : index
      %99 = vector.load %arg8[%c0_40, %c0_41] : memref<8x8xf32, #tpu.memory_space<vmem>>, vector<8x8xf32>
      %100 = math.exp %86 : vector<8x8xf32>
      %101 = arith.mulf %99, %86 : vector<8x8xf32>
      %102 = vector.shape_cast %101 : vector<8x8xf32> to vector<1x8x8xf32>
      %cst_42 = arith.constant dense<0.000000e+00> : vector<1xf32>
      %103 = vector.multi_reduction <add>, %102, %cst_42 [1, 2] : vector<1x8x8xf32> to vector<1xf32>
      %104 = vector.shape_cast %103 : vector<1xf32> to vector<1x1x1xf32>
      %105 = vector.extract %104[0, 0, 0] : f32 from vector<1x1x1xf32>
      %106 = tpu.iota {dimensions = array<i32: 0>} : vector<8x1xi32>
      %cst_43 = arith.constant 0.000000e+00 : f32
      %107 = vector.broadcast %cst_43 : f32 to vector<1x1xf32>
      %c0_i32_44 = arith.constant 0 : i32
      %108 = vector.broadcast %c0_i32_44 : i32 to vector<8x1xi32>
      %109 = arith.cmpi eq, %106, %108 : vector<8x1xi32>
      %cst_45 = arith.constant 0.000000e+00 : f32
      %110 = vector.broadcast %cst_45 : f32 to vector<8x1xf32>
      %111 = arith.select %109, %98, %110 : vector<8x1xi1>, vector<8x1xf32>
      %112 = vector.shape_cast %111 : vector<8x1xf32> to vector<1x8x1xf32>
      %cst_46 = arith.constant dense<0.000000e+00> : vector<1xf32>
      %113 = vector.multi_reduction <add>, %112, %cst_46 [1, 2] : vector<1x8x1xf32> to vector<1xf32>
      %114 = vector.shape_cast %113 : vector<1xf32> to vector<1x1x1xf32>
      %115 = vector.extract %114[0, 0, 0] : f32 from vector<1x1x1xf32>
      %116 = vector.broadcast %115 : f32 to vector<8x8xf32>
      %117 = arith.addf %100, %116 : vector<8x8xf32>
      %cst_47 = arith.constant 9.99999997E-7 : f32
      %118 = vector.broadcast %cst_47 : f32 to vector<8x8xf32>
      %119 = arith.addf %117, %118 : vector<8x8xf32>
      %120 = math.log %119 : vector<8x8xf32>
      %121 = arith.mulf %99, %120 : vector<8x8xf32>
      %122 = vector.shape_cast %121 : vector<8x8xf32> to vector<1x8x8xf32>
      %cst_48 = arith.constant dense<0.000000e+00> : vector<1xf32>
      %123 = vector.multi_reduction <add>, %122, %cst_48 [1, 2] : vector<1x8x8xf32> to vector<1xf32>
      %124 = vector.shape_cast %123 : vector<1xf32> to vector<1x1x1xf32>
      %125 = vector.extract %124[0, 0, 0] : f32 from vector<1x1x1xf32>
      %126 = vector.broadcast %125 : f32 to vector<1x1xf32>
      %127 = arith.addf %107, %126 : vector<1x1xf32>
      %c1_i32_49 = arith.constant 1 : i32
      %128 = vector.broadcast %c1_i32_49 : i32 to vector<8x1xi32>
      %129 = arith.cmpi eq, %106, %128 : vector<8x1xi32>
      %cst_50 = arith.constant 0.000000e+00 : f32
      %130 = vector.broadcast %cst_50 : f32 to vector<8x1xf32>
      %131 = arith.select %129, %98, %130 : vector<8x1xi1>, vector<8x1xf32>
      %132 = vector.shape_cast %131 : vector<8x1xf32> to vector<1x8x1xf32>
      %cst_51 = arith.constant dense<0.000000e+00> : vector<1xf32>
      %133 = vector.multi_reduction <add>, %132, %cst_51 [1, 2] : vector<1x8x1xf32> to vector<1xf32>
      %134 = vector.shape_cast %133 : vector<1xf32> to vector<1x1x1xf32>
      %135 = vector.extract %134[0, 0, 0] : f32 from vector<1x1x1xf32>
      %136 = vector.broadcast %135 : f32 to vector<8x8xf32>
      %137 = arith.addf %100, %136 : vector<8x8xf32>
      %cst_52 = arith.constant 9.99999997E-7 : f32
      %138 = vector.broadcast %cst_52 : f32 to vector<8x8xf32>
      %139 = arith.addf %137, %138 : vector<8x8xf32>
      %140 = math.log %139 : vector<8x8xf32>
      %141 = arith.mulf %99, %140 : vector<8x8xf32>
      %142 = vector.shape_cast %141 : vector<8x8xf32> to vector<1x8x8xf32>
      %cst_53 = arith.constant dense<0.000000e+00> : vector<1xf32>
      %143 = vector.multi_reduction <add>, %142, %cst_53 [1, 2] : vector<1x8x8xf32> to vector<1xf32>
      %144 = vector.shape_cast %143 : vector<1xf32> to vector<1x1x1xf32>
      %145 = vector.extract %144[0, 0, 0] : f32 from vector<1x1x1xf32>
      %146 = vector.broadcast %145 : f32 to vector<1x1xf32>
      %147 = arith.addf %127, %146 : vector<1x1xf32>
      %c2_i32 = arith.constant 2 : i32
      %148 = vector.broadcast %c2_i32 : i32 to vector<8x1xi32>
      %149 = arith.cmpi eq, %106, %148 : vector<8x1xi32>
      %cst_54 = arith.constant 0.000000e+00 : f32
      %150 = vector.broadcast %cst_54 : f32 to vector<8x1xf32>
      %151 = arith.select %149, %98, %150 : vector<8x1xi1>, vector<8x1xf32>
      %152 = vector.shape_cast %151 : vector<8x1xf32> to vector<1x8x1xf32>
      %cst_55 = arith.constant dense<0.000000e+00> : vector<1xf32>
      %153 = vector.multi_reduction <add>, %152, %cst_55 [1, 2] : vector<1x8x1xf32> to vector<1xf32>
      %154 = vector.shape_cast %153 : vector<1xf32> to vector<1x1x1xf32>
      %155 = vector.extract %154[0, 0, 0] : f32 from vector<1x1x1xf32>
      %156 = vector.broadcast %155 : f32 to vector<8x8xf32>
      %157 = arith.addf %100, %156 : vector<8x8xf32>
      %cst_56 = arith.constant 9.99999997E-7 : f32
      %158 = vector.broadcast %cst_56 : f32 to vector<8x8xf32>
      %159 = arith.addf %157, %158 : vector<8x8xf32>
      %160 = math.log %159 : vector<8x8xf32>
      %161 = arith.mulf %99, %160 : vector<8x8xf32>
      %162 = vector.shape_cast %161 : vector<8x8xf32> to vector<1x8x8xf32>
      %cst_57 = arith.constant dense<0.000000e+00> : vector<1xf32>
      %163 = vector.multi_reduction <add>, %162, %cst_57 [1, 2] : vector<1x8x8xf32> to vector<1xf32>
      %164 = vector.shape_cast %163 : vector<1xf32> to vector<1x1x1xf32>
      %165 = vector.extract %164[0, 0, 0] : f32 from vector<1x1x1xf32>
      %166 = vector.broadcast %165 : f32 to vector<1x1xf32>
      %167 = arith.addf %147, %166 : vector<1x1xf32>
      %c3_i32_58 = arith.constant 3 : i32
      %168 = vector.broadcast %c3_i32_58 : i32 to vector<8x1xi32>
      %169 = arith.cmpi eq, %106, %168 : vector<8x1xi32>
      %cst_59 = arith.constant 0.000000e+00 : f32
      %170 = vector.broadcast %cst_59 : f32 to vector<8x1xf32>
      %171 = arith.select %169, %98, %170 : vector<8x1xi1>, vector<8x1xf32>
      %172 = vector.shape_cast %171 : vector<8x1xf32> to vector<1x8x1xf32>
      %cst_60 = arith.constant dense<0.000000e+00> : vector<1xf32>
      %173 = vector.multi_reduction <add>, %172, %cst_60 [1, 2] : vector<1x8x1xf32> to vector<1xf32>
      %174 = vector.shape_cast %173 : vector<1xf32> to vector<1x1x1xf32>
      %175 = vector.extract %174[0, 0, 0] : f32 from vector<1x1x1xf32>
      %176 = vector.broadcast %175 : f32 to vector<8x8xf32>
      %177 = arith.addf %100, %176 : vector<8x8xf32>
      %cst_61 = arith.constant 9.99999997E-7 : f32
      %178 = vector.broadcast %cst_61 : f32 to vector<8x8xf32>
      %179 = arith.addf %177, %178 : vector<8x8xf32>
      %180 = math.log %179 : vector<8x8xf32>
      %181 = arith.mulf %99, %180 : vector<8x8xf32>
      %182 = vector.shape_cast %181 : vector<8x8xf32> to vector<1x8x8xf32>
      %cst_62 = arith.constant dense<0.000000e+00> : vector<1xf32>
      %183 = vector.multi_reduction <add>, %182, %cst_62 [1, 2] : vector<1x8x8xf32> to vector<1xf32>
      %184 = vector.shape_cast %183 : vector<1xf32> to vector<1x1x1xf32>
      %185 = vector.extract %184[0, 0, 0] : f32 from vector<1x1x1xf32>
      %186 = vector.broadcast %185 : f32 to vector<1x1xf32>
      %187 = arith.addf %167, %186 : vector<1x1xf32>
      %c4_i32 = arith.constant 4 : i32
      %188 = vector.broadcast %c4_i32 : i32 to vector<8x1xi32>
      %189 = arith.cmpi eq, %106, %188 : vector<8x1xi32>
      %cst_63 = arith.constant 0.000000e+00 : f32
      %190 = vector.broadcast %cst_63 : f32 to vector<8x1xf32>
      %191 = arith.select %189, %98, %190 : vector<8x1xi1>, vector<8x1xf32>
      %192 = vector.shape_cast %191 : vector<8x1xf32> to vector<1x8x1xf32>
      %cst_64 = arith.constant dense<0.000000e+00> : vector<1xf32>
      %193 = vector.multi_reduction <add>, %192, %cst_64 [1, 2] : vector<1x8x1xf32> to vector<1xf32>
      %194 = vector.shape_cast %193 : vector<1xf32> to vector<1x1x1xf32>
      %195 = vector.extract %194[0, 0, 0] : f32 from vector<1x1x1xf32>
      %196 = vector.broadcast %195 : f32 to vector<8x8xf32>
      %197 = arith.addf %100, %196 : vector<8x8xf32>
      %cst_65 = arith.constant 9.99999997E-7 : f32
      %198 = vector.broadcast %cst_65 : f32 to vector<8x8xf32>
      %199 = arith.addf %197, %198 : vector<8x8xf32>
      %200 = math.log %199 : vector<8x8xf32>
      %201 = arith.mulf %99, %200 : vector<8x8xf32>
      %202 = vector.shape_cast %201 : vector<8x8xf32> to vector<1x8x8xf32>
      %cst_66 = arith.constant dense<0.000000e+00> : vector<1xf32>
      %203 = vector.multi_reduction <add>, %202, %cst_66 [1, 2] : vector<1x8x8xf32> to vector<1xf32>
      %204 = vector.shape_cast %203 : vector<1xf32> to vector<1x1x1xf32>
      %205 = vector.extract %204[0, 0, 0] : f32 from vector<1x1x1xf32>
      %206 = vector.broadcast %205 : f32 to vector<1x1xf32>
      %207 = arith.addf %187, %206 : vector<1x1xf32>
      %c5_i32 = arith.constant 5 : i32
      %208 = vector.extract %207[0, 0] : f32 from vector<1x1xf32>
      %209 = tpu.iota {dimensions = array<i32: 0>} : vector<8x128xi32>
      %210 = tpu.iota {dimensions = array<i32: 1>} : vector<8x128xi32>
      %c0_i32_67 = arith.constant 0 : i32
      %211 = vector.broadcast %c0_i32_67 : i32 to vector<8x128xi32>
      %212 = arith.cmpi eq, %209, %211 : vector<8x128xi32>
      %c0_i32_68 = arith.constant 0 : i32
      %213 = vector.broadcast %c0_i32_68 : i32 to vector<8x128xi32>
      %214 = arith.cmpi eq, %210, %213 : vector<8x128xi32>
      %215 = arith.andi %212, %214 : vector<8x128xi1>
      %cst_69 = arith.constant 0.000000e+00 : f32
      %216 = vector.broadcast %57 : f32 to vector<8x128xf32>
      %217 = vector.broadcast %cst_69 : f32 to vector<8x128xf32>
      %218 = arith.select %215, %216, %217 : vector<8x128xi1>, vector<8x128xf32>
      %c0_i32_70 = arith.constant 0 : i32
      %219 = vector.broadcast %c0_i32_70 : i32 to vector<8x128xi32>
      %220 = arith.cmpi eq, %209, %219 : vector<8x128xi32>
      %c1_i32_71 = arith.constant 1 : i32
      %221 = vector.broadcast %c1_i32_71 : i32 to vector<8x128xi32>
      %222 = arith.cmpi eq, %210, %221 : vector<8x128xi32>
      %223 = arith.andi %220, %222 : vector<8x128xi1>
      %224 = vector.broadcast %65 : f32 to vector<8x128xf32>
      %225 = arith.select %223, %224, %218 : vector<8x128xi1>, vector<8x128xf32>
      %c0_i32_72 = arith.constant 0 : i32
      %226 = vector.broadcast %c0_i32_72 : i32 to vector<8x128xi32>
      %227 = arith.cmpi eq, %209, %226 : vector<8x128xi32>
      %c2_i32_73 = arith.constant 2 : i32
      %228 = vector.broadcast %c2_i32_73 : i32 to vector<8x128xi32>
      %229 = arith.cmpi eq, %210, %228 : vector<8x128xi32>
      %230 = arith.andi %227, %229 : vector<8x128xi1>
      %231 = vector.broadcast %208 : f32 to vector<8x128xf32>
      %232 = arith.select %230, %231, %225 : vector<8x128xi1>, vector<8x128xf32>
      %c0_i32_74 = arith.constant 0 : i32
      %233 = vector.broadcast %c0_i32_74 : i32 to vector<8x128xi32>
      %234 = arith.cmpi eq, %209, %233 : vector<8x128xi32>
      %c3_i32_75 = arith.constant 3 : i32
      %235 = vector.broadcast %c3_i32_75 : i32 to vector<8x128xi32>
      %236 = arith.cmpi eq, %210, %235 : vector<8x128xi32>
      %237 = arith.andi %234, %236 : vector<8x128xi1>
      %238 = vector.broadcast %105 : f32 to vector<8x128xf32>
      %239 = arith.select %237, %238, %232 : vector<8x128xi1>, vector<8x128xf32>
      %c0_76 = arith.constant 0 : index
      %c0_77 = arith.constant 0 : index
      %240 = vector.load %arg9[%c0_76, %c0_77] : memref<8x128xf32, #tpu.memory_space<vmem>>, vector<8x128xf32>
      tpu.vector_store %arg9[%c0_76, %c0_77], %239 {strides = array<i32>} : memref<8x128xf32, #tpu.memory_space<vmem>>, vector<8x128xf32>,
    } else {
    }
    return
  }
  func.func @transform_0(%arg0: i32, %arg1: i32) -> (i32, i32) {
    %c1_i32 = arith.constant 1 : i32
    %0 = arith.muli %arg0, %c1_i32 : i32
    %1 = arith.addi %0, %arg1 : i32
    %c0_i32 = arith.constant 0 : i32
    %c0_i32_0 = arith.constant 0 : i32
    return %1, %c0_i32 : i32, i32
  }
  func.func @transform_1(%arg0: i32, %arg1: i32) -> (i32, i32) {
    %c1_i32 = arith.constant 1 : i32
    %0 = arith.muli %arg0, %c1_i32 : i32
    %1 = arith.addi %0, %arg1 : i32
    %c0_i32 = arith.constant 0 : i32
    %c0_i32_0 = arith.constant 0 : i32
    return %1, %c0_i32 : i32, i32
  }
  func.func @transform_2(%arg0: i32, %arg1: i32) -> (i32, i32) {
    %c0_i32 = arith.constant 0 : i32
    %c0_i32_0 = arith.constant 0 : i32
    %c0_i32_1 = arith.constant 0 : i32
    return %c0_i32, %c0_i32_0 : i32, i32
  }
  func.func @transform_3(%arg0: i32, %arg1: i32) -> (i32, i32) {
    %c0_i32 = arith.constant 0 : i32
    %c0_i32_0 = arith.constant 0 : i32
    %c0_i32_1 = arith.constant 0 : i32
    return %c0_i32, %c0_i32_0 : i32, i32
  }
  func.func @transform_4(%arg0: i32, %arg1: i32) -> (i32, i32) {
    %c0_i32 = arith.constant 0 : i32
    %c0_i32_0 = arith.constant 0 : i32
    %c0_i32_1 = arith.constant 0 : i32
    return %c0_i32, %c0_i32_0 : i32, i32
  }
  func.func @transform_5(%arg0: i32, %arg1: i32) -> (i32, i32) {
    %c0_i32 = arith.constant 0 : i32
    %c0_i32_0 = arith.constant 0 : i32
    %c0_i32_1 = arith.constant 0 : i32
    return %c0_i32, %c0_i32_0 : i32, i32
  }
  func.func @transform_6(%arg0: i32, %arg1: i32) -> (i32, i32) {
    %c0_i32 = arith.constant 0 : i32
    %c0_i32_0 = arith.constant 0 : i32
    %c0_i32_1 = arith.constant 0 : i32
    return %c0_i32, %c0_i32_0 : i32, i32
  }
  func.func @transform_7(%arg0: i32, %arg1: i32) -> (i32, i32) {
    %c0_i32 = arith.constant 0 : i32
    %c0_i32_0 = arith.constant 0 : i32
    return %arg0, %c0_i32 : i32, i32
  }
}

</mosaic_0001>

<bundles_post_ra>
// kernel: _fused_forward.1
= control target key start
LH: loop header
LB: loop body
LE: loop exit
PB: predicated region body
PF: predicated region fallthrough
CT: control target
= control target key end

     0   :  { %v654_v4 = vmov 0.0   ;;  %vm655_vm0 = vmmov 0   ;;  %v150_v40 = vlaneseq  ;;  %vm366_vm6 = vcmask 64512   ;;  %s798_s5 = inlined_call_operand.vmem [shape: f32[8,128], index: 5, kind: input, shape index: {}]   ;;  %s799_s4 = inlined_call_operand.vmem [shape: f32[8,128], index: 4, kind: input, shape index: {}]   ;;  %s800_s2 = inlined_call_operand.vmem [shape: f32[8,128], index: 2, kind: input, shape index: {}]   ;;  %s801_s3 = inlined_call_operand.vmem [shape: f32[8,128], index: 3, kind: input, shape index: {}]   ;;  %s802_s0 = inlined_call_operand.vmem [shape: f32[16,128], index: 0, kind: input, shape index: {}]   ;;  %s803_s1 = inlined_call_operand.vmem [shape: bf16[16,128], index: 1, kind: input, shape index: {}]   ;;  %s804_s6 = inlined_call_operand.vmem [shape: f32[8,8], index: 6, kind: input, shape index: {}]   ;;  %s805_s7 = inlined_call_operand.vmem [shape: f32[8,128], index: 7, kind: output, shape index: {}]  }
   0x1   :  { %v208_v0 = vld [vmem:[%s798_s5] sm:$0xff]  ;;  %589 = vmatprep.subr.mxu1 %v654_v4  ;;  %584 = vmatprep.subr.mxu0 %v654_v4  ;;  %v76_v18 = vld [vmem:[%s802_s0 + $0x8] sm:$0xff]  ;;  %vm388_vm8 = vcmask 7168  }
   0x2   :  { %v201_v1 = vld [vmem:[%s799_s4] sm:$0xff]  ;;  %v209_v2 = vmul.f32 %v208_v0, %v208_v0  ;;  %591 = vmatprep.mubr.msk.f32.mxu1 %vm655_vm0, %v654_v4  ;;  %586 = vmatprep.mubr.msk.f32.mxu0 %vm655_vm0, %v654_v4  ;;  %v82_v20 = vand.u32 2147483647, %v76_v18  ;;  %vm108_vm2 = vcmp.ge.f32.partialorder %v76_v18, 0.0  ;;  %v721_v45 = vshrl.u32 %v150_v40, 7 }
   0x3   :  { %v202_v3 = vmul.f32 %v201_v1, %v201_v1  ;;  %v188_v13 = vld [vmem:[%s800_s2] sm:$0xff]  ;;  %v96_v48 = vmax.f32 %v76_v18, 0.0  ;;  %v724_v62 = vand.u32 127, %v150_v40 }
   0x4   :  { %210 = vadd.xlane.f32.xlu0 %v209_v2  ;;  %v189_v14 = vld [vmem:[%s801_s3] sm:$0xff]  ;;  %v572_v22 = vmul.f32 -1.442695, %v82_v20  ;;  %v152_v54 = vadd.s32 8, %v721_v45  ;;  %v159_v2 = vmul.u32 128, %v721_v45  ;;  %vm386_vm7 = vcmp.eq.s32.totalorder %v721_v45, 0 }
   0x5   :  { %v190_v15 = vsub.f32 %v188_v13, %v189_v14  ;;  %v75_v17 = vld [vmem:[%s802_s0] sm:$0xff]  ;;  %vm360_vm5 = vcmp.lt.s32.totalorder %v724_v62, 3  ;;  %vm417_vm9 = vcmp.eq.s32.totalorder %v721_v45, 1  ;;  %vm447_vm10 = vcmp.eq.s32.totalorder %v721_v45, 2 }
   0x6   :  { %v81_v19 = vand.u32 2147483647, %v75_v17  ;;  %v577_v29 = vld [vmem:[%s803_s1] sm:$0xff]   ;;  %vm107_vm1 = vcmp.ge.f32.partialorder %v75_v17, 0.0  ;;  %v95_v47 = vmax.f32 %v75_v17, 0.0  ;;  %vm477_vm11 = vcmp.eq.s32.totalorder %v721_v45, 3 }
   0x7   :  { %v191_v16 = vand.u32 2147483647, %v190_v15  ;;  %v578_v32 = vunpack.c.l.bf16 %v577_v29  ;;  %v579_v33 = vunpack.c.h.bf16 %v577_v29  ;;  %v161_v15 = vadd.s32 %v159_v2, %v724_v62 }
   0x8   :  { %203 = vadd.xlane.f32.xlu0 %v202_v3  ;;  %v571_v21 = vmul.f32 -1.442695, %v81_v19  ;;  %v160_v3 = vmul.u32 128, %v152_v54  ;;  %vm507_vm12 = vcmp.eq.s32.totalorder %v721_v45, 4  ;;  %vm538_vm13 = vcmp.eq.s32.totalorder %v724_v62, 0 }
   0x9   :  { %v117_v38 = vsub.f32 1.0, %v578_v32  ;;  %v118_v39 = vsub.f32 1.0, %v579_v33  ;;  %v97_v49 = vmul.f32 %v578_v32, %v75_v17  ;;  %v98_v50 = vmul.f32 %v579_v33, %v76_v18  ;;  %vm539_vm15 = vmand %vm386_vm7, %vm538_vm13 }
   0xa   :  { %vm163_vm3 = vcmp.lt.s32.totalorder %v161_v15, 64  ;;  %vm542_vm14 = vcmp.eq.s32.totalorder %v724_v62, 1 }
   0xb   :  { %v99_v55 = vsub.f32 %v95_v47, %v97_v49  ;;  %v100_v56 = vsub.f32 %v96_v48, %v98_v50  ;;  %v132_v13 = vmul.f32 0.75, %v118_v39  ;;  %vm543_vm0 = vmand %vm386_vm7, %vm542_vm14 }
   0xc   :  { %192 = vadd.xlane.f32.xlu0 %v191_v16  ;;  %v162_v16 = vadd.s32 %v160_v3, %v724_v62 }
   0xe   :  { %vm164_vm4 = vcmp.lt.s32.totalorder %v162_v16, 64 }
  0x91   :  { %v211_v5 = vpop.xlane.xlu0 %210 }
  0x92   :  { %v212_v6 = vmax.f32 %v211_v5, 1e-24 }
  0x94   :  { %624 = vrsqrt.f32 %v212_v6 }
  0x95   :  { %v204_v7 = vpop.xlane.xlu0 %203 }
  0x96   :  { %v205_v8 = vmax.f32 %v204_v7, 1e-24  ;;  %v130_v7 = vmul.f32 0.25, %v579_v33 }
  0x98   :  { %626 = vrsqrt.f32 %v205_v8  ;;  %v131_v8 = vmul.f32 0.75, %v117_v38  ;;  %v134_v20 = vadd.f32 %v132_v13, %v130_v7 }
  0x99   :  { %628 = vpow2.f32 %v571_v21 }
  0x9a   :  { %630 = vpow2.f32 %v572_v22 }
  0x9e   :  { %v625_v9 = vpop.eup %624 }
  0x9f   :  { %v214_v10 = vmul.f32 %v625_v9, %v208_v0 }
  0xa1   :  { %590 = vmatpush3.xpose.msra.mxu1 %v214_v10 }
  0xa2   :  { %v627_v11 = vpop.eup %626 }
  0xa3   :  { %v207_v12 = vmul.f32 %v627_v11, %v201_v1  ;;  %v629_v23 = vpop.eup %628  ;;  %v129_v1 = vmul.f32 0.25, %v578_v32 }
  0xa4   :  { %v631_v24 = vpop.eup %630  ;;  %v89_v25 = vadd.f32 1.0, %v629_v23  ;;  %v573_v23 = vsel %vm163_vm3, 1.0, %v654_v4 }
  0xa5   :  { %585 = vmatpush3.xpose.msra.mxu0 %v207_v12  ;;  %592 = vmatmul.mubr.f32.vlgmr.msra.gmra.mrb[0].mxu1 %v207_v12  ;;  %v90_v26 = vadd.f32 1.0, %v631_v24  ;;  %v133_v19 = vadd.f32 %v131_v8, %v129_v1  ;;  %v574_v24 = vsel %vm164_vm4, 1.0, %v654_v4 }
  0xa6   :  { %632 = vrcp.f32 %v89_v25  ;;  %v575_v25 = vsel %vm360_vm5, 1.0, %v654_v4 }
  0xa7   :  { %634 = vrcp.f32 %v90_v26 }
  0xa8   :  { %587 = vmatmul.mubr.f32.vlgmr.msra.gmra.mrb[0].mxu0 %v207_v12 }
  0xb0   :  { %v633_v27 = vpop.eup %632 }
  0xb1   :  { %v635_v28 = vpop.eup %634  ;;  %v109_v30 = vsub.f32 1.0, %v633_v27  ;;  %636 = vlog2.f32 %v633_v27 }
  0xb2   :  { %v110_v31 = vsub.f32 1.0, %v635_v28  ;;  %638 = vlog2.f32 %v635_v28 }
  0xb3   :  { %v111_v34 = vsel %vm107_vm1, %v633_v27, %v109_v30  ;;  %vm546_vm1 = vcmp.eq.s32.totalorder %v724_v62, 2 }
  0xb4   :  { %v112_v35 = vsel %vm108_vm2, %v635_v28, %v110_v31  ;;  %v115_v36 = vsub.f32 1.0, %v111_v34  ;;  %v113_v41 = vmul.f32 %v578_v32, %v111_v34  ;;  %vm550_vm2 = vcmp.eq.s32.totalorder %v724_v62, 3  ;;  %vm547_vm3 = vmand %vm386_vm7, %vm546_vm1 }
  0xb5   :  { %v116_v37 = vsub.f32 1.0, %v112_v35  ;;  %v114_v42 = vmul.f32 %v579_v33, %v112_v35  ;;  %v739_v33 = vld [vmem:[%s804_s6] sm:$0xff]  ;;  %v193_v35 = vpop.xlane.xlu0 %192  ;;  %vm551_vm4 = vmand %vm386_vm7, %vm550_vm2 }
  0xb6   :  { %v119_v43 = vmul.f32 %v117_v38, %v115_v36  ;;  %v194_v36 = vrot.slane %v193_v35, 4 }
  0xb7   :  { %v120_v44 = vmul.f32 %v118_v39, %v116_v37 }
  0xb8   :  { %v121_v52 = vadd.f32 %v119_v43, %v113_v41  ;;  %v195_v37 = vadd.f32 %v194_v36, %v193_v35 }
  0xb9   :  { %v122_v53 = vadd.f32 %v120_v44, %v114_v42 }
  0xba   :  { %v123_v59 = vsub.f32 1.0, %v121_v52  ;;  %v196_v41 = vrot.slane %v195_v37, 2 }
  0xbb   :  { %v637_v46 = vpop.eup %636  ;;  %v124_v60 = vsub.f32 1.0, %v122_v53 }
  0xbc   :  { %v639_v51 = vpop.eup %638  ;;  %v102_v57 = vmul.f32 0.6931472, %v637_v46  ;;  %v125_v11 = vmul.f32 %v123_v59, %v123_v59  ;;  %v197_v47 = vadd.f32 %v196_v41, %v195_v37 }
  0xbd   :  { %v104_v58 = vmul.f32 0.6931472, %v639_v51  ;;  %v126_v12 = vmul.f32 %v124_v60, %v124_v60 }
  0xbe   :  { %v105_v5 = vsub.f32 %v99_v55, %v102_v57  ;;  %v198_v54 = vrot.slane %v197_v47, 1 }
  0xbf   :  { %v106_v6 = vsub.f32 %v100_v56, %v104_v58 }
  0xc0   :  { %v127_v17 = vmul.f32 %v125_v11, %v105_v5 }
  0xc1   :  { %v128_v18 = vmul.f32 %v126_v12, %v106_v6 }
  0xc2   :  { %v135_v21 = vmul.f32 %v133_v19, %v127_v17 }
  0xc3   :  { %v136_v22 = vmul.f32 %v134_v20, %v128_v18 }
  0xc4   :  { %v170_v27 = vmul.f32 %v573_v23, %v135_v21 }
  0xc5   :  { %v171_v28 = vmul.f32 %v574_v24, %v136_v22 }
  0xc7   :  { %v172_v32 = vadd.f32 %v171_v28, %v170_v27 }
 0x178   :  { %v353_v61 = vpop.f32.mrb[0].mxu1 }
 0x179   :  { %v357_v63 = vmul.f32 2.0, %v353_v61  ;;  %v593_v0 = vpop.f32.mrb[1].mxu1  ;;  %v199_v61 = vadd.f32 %v198_v54, %v197_v47 }
 0x17b   :  { %v363_v9 = vmul.f32 1.442695, %v357_v63  ;;  %v281_v10 = vpop.f32.mrb[0].mxu0 }
 0x17c   :  { %v588_v14 = vpop.f32.mrb[1].mxu0  ;;  %v733_v30 = vmul.f32 2.0, %v281_v10 }
 0x17d   :  { %640 = vpow2.f32 %v363_v9 }
 0x17e   :  { %v373_v34 = vmul.f32 %v739_v33, %v733_v30  ;;  %v371_v17 = vmul.f32 1.442695, %v733_v30 }
 0x180   :  { %v374_v4 = vsel %vm366_vm6, %v373_v34, 0.0  ;;  %642 = vpow2.f32 %v371_v17 }
 0x187   :  { %v641_v26 = vpop.eup %640 }
 0x188   :  { %v365_v29 = vmul.f32 %v641_v26, %v575_v25 }
 0x18a   :  { %v367_v31 = vsel %vm366_vm6, %v365_v29, 0.0  ;;  %v767_v18 = vpop.eup %642 }
 0x18b   :  { %368 = vadd.xlane.f32.xlu1 %v367_v31 }
 0x18f   :  { %179 = vadd.xlane.f32.xlu1 %v172_v32 }
 0x193   :  { %375 = vadd.xlane.f32.xlu1 %v374_v4 }
 0x218   :  { %v369_v38 = vpop.xlane.xlu1 %368 }
 0x219   :  { %v387_v39 = vsel %vm386_vm7, %v369_v38, 0.0  ;;  %v418_v42 = vsel %vm417_vm9, %v369_v38, 0.0  ;;  %v448_v49 = vsel %vm447_vm10, %v369_v38, 0.0  ;;  %v478_v56 = vsel %vm477_vm11, %v369_v38, 0.0 }
 0x21a   :  { %v389_v40 = vsel %vm388_vm8, %v387_v39, 0.0  ;;  %v419_v46 = vsel %vm388_vm8, %v418_v42, 0.0  ;;  %v449_v53 = vsel %vm388_vm8, %v448_v49, 0.0  ;;  %v479_v60 = vsel %vm388_vm8, %v478_v56, 0.0 }
 0x21b   :  { %390 = vadd.xlane.f32.xlu0 %v389_v40  ;;  %v508_v63 = vsel %vm507_vm12, %v369_v38, 0.0 }
 0x21c   :  { %v180_v43 = vpop.xlane.xlu1 %179  ;;  %v509_v3 = vsel %vm388_vm8, %v508_v63, 0.0 }
 0x21d   :  { %v181_v44 = vrot.slane %v180_v43, 4 }
 0x21f   :  { %v182_v48 = vadd.f32 %v181_v44, %v180_v43  ;;  %420 = vadd.xlane.f32.xlu0 %v419_v46 }
 0x220   :  { %v376_v50 = vpop.xlane.xlu1 %375 }
 0x221   :  { %v183_v51 = vrot.slane %v182_v48, 2  ;;  %v377_v52 = vrot.slane %v376_v50, 4 }
 0x223   :  { %v378_v55 = vadd.f32 %v377_v52, %v376_v50  ;;  %450 = vadd.xlane.f32.xlu0 %v449_v53  ;;  %v184_v57 = vadd.f32 %v183_v51, %v182_v48 }
 0x225   :  { %v379_v58 = vrot.slane %v378_v55, 2  ;;  %v185_v59 = vrot.slane %v184_v57, 1 }
 0x227   :  { %480 = vadd.xlane.f32.xlu0 %v479_v60  ;;  %v186_v0 = vadd.f32 %v185_v59, %v184_v57  ;;  %v380_v1 = vadd.f32 %v379_v58, %v378_v55 }
 0x229   :  { %594 = vpush %v186_v0  ;;  %v381_v2 = vrot.slane %v380_v1, 1 }
 0x22a   :  { %596 = vpush %v199_v61 }
 0x22b   :  { %510 = vadd.xlane.f32.xlu0 %v509_v3  ;;  %v382_v5 = vadd.f32 %v381_v2, %v380_v1 }
 0x22d   :  { %598 = vpush %v382_v5 }
 0x25a   :  { %s595_s6 = spop %594 }
 0x25b   :  { %v540_v6 = vstv %s595_s6  ;;  %s597_s11 = spop %596 }
 0x25c   :  { %v541_v7 = vsel %vm539_vm15, %v540_v6, 0.0  ;;  %v544_v8 = vstv %s597_s11 }
 0x25d   :  { %v762_v9 = vsel %vm543_vm0, %v544_v8, %v541_v7 }
 0x25e   :  { %s765_s12 = spop %598 }
 0x2a8   :  { %v391_v10 = vpop.xlane.xlu0 %390 }
 0x2a9   :  { %v392_v11 = vrot.slane %v391_v10, 4 }
 0x2ab   :  { %v393_v12 = vadd.f32 %v392_v11, %v391_v10 }
 0x2ac   :  { %v421_v26 = vpop.xlane.xlu0 %420 }
 0x2ad   :  { %v394_v13 = vrot.slane %v393_v12, 2  ;;  %v422_v27 = vrot.slane %v421_v26, 4 }
 0x2af   :  { %v395_v14 = vadd.f32 %v394_v13, %v393_v12  ;;  %v423_v28 = vadd.f32 %v422_v27, %v421_v26 }
 0x2b0   :  { %v451_v48 = vpop.xlane.xlu0 %450 }
 0x2b1   :  { %v396_v15 = vrot.slane %v395_v14, 1  ;;  %v424_v29 = vrot.slane %v423_v28, 2  ;;  %v452_v49 = vrot.slane %v451_v48, 4 }
 0x2b3   :  { %v397_v16 = vadd.f32 %v396_v15, %v395_v14  ;;  %v425_v34 = vadd.f32 %v424_v29, %v423_v28  ;;  %v453_v50 = vadd.f32 %v452_v49, %v451_v48 }
 0x2b4   :  { %v481_v11 = vpop.xlane.xlu0 %480 }
 0x2b5   :  { %600 = vpush %v397_v16  ;;  %v426_v36 = vrot.slane %v425_v34, 1  ;;  %v454_v51 = vrot.slane %v453_v50, 2  ;;  %v482_v12 = vrot.slane %v481_v11, 4 }
 0x2b7   :  { %v427_v39 = vadd.f32 %v426_v36, %v425_v34  ;;  %v455_v55 = vadd.f32 %v454_v51, %v453_v50  ;;  %v483_v13 = vadd.f32 %v482_v12, %v481_v11 }
 0x2b9   :  { %v456_v58 = vrot.slane %v455_v55, 1  ;;  %v484_v14 = vrot.slane %v483_v13, 2 }
 0x2bb   :  { %v457_v61 = vadd.f32 %v456_v58, %v455_v55 }
 0x2e6   :  { %s601_s13 = spop %600 }
 0x2e7   :  { %v399_v19 = vstv %s601_s13 }
 0x2e8   :  { %v400_v20 = vadd.f32 %v767_v18, %v399_v19  ;;  %v485_v19 = vadd.f32 %v484_v14, %v483_v13 }
 0x2ea   :  { %v401_v21 = vadd.f32 1e-06, %v400_v20 }
 0x2ec   :  { %644 = vlog2.f32 %v401_v21 }
 0x2f6   :  { %v645_v22 = vpop.eup %644 }
 0x2f7   :  { %v403_v23 = vmul.f32 0.6931472, %v645_v22  ;;  %v486_v22 = vrot.slane %v485_v19, 1 }
 0x2f9   :  { %v404_v24 = vmul.f32 %v403_v23, %v739_v33 }
 0x2fb   :  { %v405_v25 = vsel %vm366_vm6, %v404_v24, 0.0 }
 0x2fc   :  { %406 = vadd.xlane.f32.xlu1 %v405_v25  ;;  %v487_v25 = vadd.f32 %v486_v22, %v485_v19 }
 0x389   :  { %v407_v30 = vpop.xlane.xlu1 %406 }
 0x38a   :  { %v408_v31 = vrot.slane %v407_v30, 4 }
 0x38c   :  { %v409_v32 = vadd.f32 %v408_v31, %v407_v30 }
 0x38e   :  { %v410_v4 = vrot.slane %v409_v32, 2 }
 0x390   :  { %v411_v35 = vadd.f32 %v410_v4, %v409_v32 }
 0x392   :  { %v412_v37 = vrot.slane %v411_v35, 1 }
 0x394   :  { %v413_v38 = vadd.f32 %v412_v37, %v411_v35  ;;  %v511_v35 = vpop.xlane.xlu0 %510 }
 0x395   :  { %v512_v36 = vrot.slane %v511_v35, 4 }
 0x396   :  { %602 = vpush %v413_v38 }
 0x397   :  { %604 = vpush %v427_v39  ;;  %v513_v37 = vadd.f32 %v512_v36, %v511_v35 }
 0x399   :  { %v514_v38 = vrot.slane %v513_v37, 2 }
 0x3c7   :  { %s772_s14 = spop %602 }
 0x3c8   :  { %s605_s15 = spop %604  ;;  %v415_v63 = vstv %s772_s14 }
 0x3c9   :  { %v429_v40 = vstv %s605_s15 }
 0x3ca   :  { %v430_v41 = vadd.f32 %v767_v18, %v429_v40 }
 0x3cc   :  { %v431_v42 = vadd.f32 1e-06, %v430_v41 }
 0x3ce   :  { %646 = vlog2.f32 %v431_v42  ;;  %v515_v42 = vadd.f32 %v514_v38, %v513_v37 }
 0x3d8   :  { %v647_v43 = vpop.eup %646 }
 0x3d9   :  { %v433_v44 = vmul.f32 0.6931472, %v647_v43 }
 0x3db   :  { %v434_v46 = vmul.f32 %v433_v44, %v739_v33 }
 0x3dd   :  { %v435_v47 = vsel %vm366_vm6, %v434_v46, 0.0  ;;  %v516_v46 = vrot.slane %v515_v42, 1 }
 0x3de   :  { %436 = vadd.xlane.f32.xlu1 %v435_v47 }
 0x3df   :  { %v517_v49 = vadd.f32 %v516_v46, %v515_v42 }
 0x46b   :  { %v437_v52 = vpop.xlane.xlu1 %436 }
 0x46c   :  { %v438_v53 = vrot.slane %v437_v52, 4 }
 0x46e   :  { %v439_v54 = vadd.f32 %v438_v53, %v437_v52 }
 0x470   :  { %v440_v56 = vrot.slane %v439_v54, 2 }
 0x472   :  { %v441_v57 = vadd.f32 %v440_v56, %v439_v54 }
 0x474   :  { %v442_v59 = vrot.slane %v441_v57, 1 }
 0x476   :  { %v443_v60 = vadd.f32 %v442_v59, %v441_v57 }
 0x478   :  { %606 = vpush %v443_v60 }
 0x479   :  { %608 = vpush %v457_v61 }
 0x4a9   :  { %s607_s16 = spop %606 }
 0x4aa   :  { %v445_v0 = vstv %s607_s16  ;;  %s609_s17 = spop %608 }
 0x4ab   :  { %v446_v1 = vadd.f32 %v445_v0, %v415_v63  ;;  %v459_v2 = vstv %s609_s17 }
 0x4ac   :  { %v460_v3 = vadd.f32 %v767_v18, %v459_v2 }
 0x4ae   :  { %v461_v5 = vadd.f32 1e-06, %v460_v3 }
 0x4b0   :  { %648 = vlog2.f32 %v461_v5  ;;  %v552_v5 = vstv %s765_s12 }
 0x4ba   :  { %v649_v6 = vpop.eup %648 }
 0x4bb   :  { %v463_v7 = vmul.f32 0.6931472, %v649_v6 }
 0x4bd   :  { %v464_v8 = vmul.f32 %v463_v7, %v739_v33 }
 0x4bf   :  { %v465_v10 = vsel %vm366_vm6, %v464_v8, 0.0 }
 0x4c0   :  { %466 = vadd.xlane.f32.xlu1 %v465_v10 }
 0x54d   :  { %v467_v15 = vpop.xlane.xlu1 %466 }
 0x54e   :  { %v468_v16 = vrot.slane %v467_v15, 4 }
 0x550   :  { %v469_v17 = vadd.f32 %v468_v16, %v467_v15 }
 0x552   :  { %v470_v20 = vrot.slane %v469_v17, 2 }
 0x554   :  { %v471_v21 = vadd.f32 %v470_v20, %v469_v17 }
 0x556   :  { %v472_v23 = vrot.slane %v471_v21, 1 }
 0x558   :  { %v473_v24 = vadd.f32 %v472_v23, %v471_v21 }
 0x55a   :  { %610 = vpush %v473_v24 }
 0x55b   :  { %612 = vpush %v487_v25 }
 0x58b   :  { %s611_s18 = spop %610 }
 0x58c   :  { %v475_v26 = vstv %s611_s18  ;;  %s613_s19 = spop %612 }
 0x58d   :  { %v476_v27 = vadd.f32 %v475_v26, %v446_v1  ;;  %v489_v28 = vstv %s613_s19 }
 0x58e   :  { %v490_v29 = vadd.f32 %v767_v18, %v489_v28 }
 0x590   :  { %v491_v30 = vadd.f32 1e-06, %v490_v29 }
 0x592   :  { %650 = vlog2.f32 %v491_v30 }
 0x59c   :  { %v651_v31 = vpop.eup %650 }
 0x59d   :  { %v493_v32 = vmul.f32 0.6931472, %v651_v31 }
 0x59f   :  { %v494_v34 = vmul.f32 %v493_v32, %v739_v33 }
 0x5a1   :  { %v495_v4 = vsel %vm366_vm6, %v494_v34, 0.0 }
 0x5a2   :  { %496 = vadd.xlane.f32.xlu1 %v495_v4 }
 0x62f   :  { %v497_v39 = vpop.xlane.xlu1 %496 }
 0x630   :  { %v498_v40 = vrot.slane %v497_v39, 4 }
 0x632   :  { %v499_v41 = vadd.f32 %v498_v40, %v497_v39 }
 0x634   :  { %v500_v43 = vrot.slane %v499_v41, 2 }
 0x636   :  { %v501_v44 = vadd.f32 %v500_v43, %v499_v41 }
 0x638   :  { %v502_v47 = vrot.slane %v501_v44, 1 }
 0x63a   :  { %v503_v48 = vadd.f32 %v502_v47, %v501_v44 }
 0x63c   :  { %614 = vpush %v503_v48 }
 0x63d   :  { %616 = vpush %v517_v49 }
 0x66d   :  { %s615_s20 = spop %614 }
 0x66e   :  { %v505_v50 = vstv %s615_s20  ;;  %s617_s21 = spop %616 }
 0x66f   :  { %v506_v51 = vadd.f32 %v505_v50, %v476_v27  ;;  %v519_v52 = vstv %s617_s21 }
 0x670   :  { %v520_v53 = vadd.f32 %v767_v18, %v519_v52 }
 0x672   :  { %v521_v54 = vadd.f32 1e-06, %v520_v53 }
 0x674   :  { %652 = vlog2.f32 %v521_v54 }
 0x67e   :  { %v653_v55 = vpop.eup %652 }
 0x67f   :  { %v523_v56 = vmul.f32 0.6931472, %v653_v55 }
 0x681   :  { %v524_v57 = vmul.f32 %v523_v56, %v739_v33 }
 0x683   :  { %v525_v58 = vsel %vm366_vm6, %v524_v57, 0.0 }
 0x684   :  { %526 = vadd.xlane.f32.xlu1 %v525_v58 }
 0x711   :  { %v527_v59 = vpop.xlane.xlu1 %526 }
 0x712   :  { %v528_v60 = vrot.slane %v527_v59, 4 }
 0x714   :  { %v529_v61 = vadd.f32 %v528_v60, %v527_v59 }
 0x716   :  { %v530_v63 = vrot.slane %v529_v61, 2 }
 0x718   :  { %v531_v0 = vadd.f32 %v530_v63, %v529_v61 }
 0x71a   :  { %v532_v1 = vrot.slane %v531_v0, 1 }
 0x71c   :  { %v533_v2 = vadd.f32 %v532_v1, %v531_v0 }
 0x71e   :  { %618 = vpush %v533_v2 }
 0x74f   :  { %s619_s22 = spop %618 }
 0x750   :  { %v535_v18 = vstv %s619_s22 }
 0x751   :  { %v536_v3 = vadd.f32 %v535_v18, %v506_v51 }
 0x753   :  { %620 = vpush %v536_v3 }
 0x784   :  { %s621_s23 = spop %620 }
 0x785   :  { %v548_v33 = vstv %s621_s23 }
 0x786   :  { %v549_v6 = vsel %vm547_vm3, %v548_v33, %v762_v9 }
 0x787   :  { %v553_v7 = vsel %vm551_vm4, %v552_v5, %v549_v6 }
 0x788   :  { %554 = vst [vmem:[%s805_s7] sm:$0xff] %v553_v7 }

</bundles_post_ra>
